<compile_context>
chip_gen: v6e
topology: v6e:2x2x1
jax: 0.10.0
libtpu: 0.0.40
codegen_flags: <defaults>
</compile_context>

<pallas_src>
import functools
import math

import jax
import jax.numpy as jnp
from jax.experimental import pallas as pl
from jax.experimental.pallas import tpu as pltpu


def _cdiv(a, b):
    return -(-a // b)


def _round_up(a, b):
    return _cdiv(a, b) * b


# Static config: single-buffer the constant-index operands (LUT / weight / bias / special
# row).  Only worth flipping on when the real LUT / weight are large enough that their
# duplicated double-buffer copy matters against v7x's 64 MiB/TC VMEM.
_SINGLE_BUFFER_CONSTS = False
_HAS_BUFFERED = hasattr(pl, "Buffered")


def _midiformer_front_kernel(ids_ref, lut_ref, wt_ref, b_ref, sp_ref, out_ref):
    # ids_ref : (1, TB*S, 1)    int32   token ids for one batch block
    # lut_ref : (V, E)          bf16    word_emb.lut.weight * sqrt(d_model)
    # wt_ref  : (E, Hpad)       bf16    in_linear.weight^T, lane-padded to Hpad
    # b_ref   : (1, Hpad)       f32     in_linear.bias, lane-padded
    # sp_ref  : (1, Hpad)       f32     former word-embedding row for the special mark
    # out_ref : (TB, S+1, Hpad) bf16    [special_emb ; in_linear(EMA(SimAM(Embeddings(ids))))]
    tb, slen_p1, hpad = out_ref.shape
    slen = slen_p1 - 1
    n_token, emb_size = lut_ref.shape
    rows = tb * slen

    # Embedding lookup as a bf16 one-hot matmul (exact 0/1 one-hot; each row selects a
    # single LUT row, so the f32-accumulated result equals the bf16 LUT row exactly).
    # The * sqrt(d_model) Embeddings scale is folded into the LUT at prep time.
    ids = ids_ref[...].reshape(rows, 1)
    tok_iota = jax.lax.broadcasted_iota(jnp.int32, (rows, n_token), 1)
    onehot = (ids == tok_iota).astype(jnp.bfloat16)
    emb = jnp.dot(onehot, lut_ref[...], preferred_element_type=jnp.float32)    # (rows, E)

    # SimAM: the PyTorch code reduces NCHW dims [2,3] with H=S, W=1, i.e. per (batch,
    # channel) statistics over the sequence axis -> axis=1 of the (TB, S, E) view.
    emb3 = emb.reshape(tb, slen, emb_size)
    mu = jnp.mean(emb3, axis=1, keepdims=True)                                 # (TB, 1, E)
    diff = emb3 - mu
    d2 = diff * diff
    inv_n = 1.0 / float(slen * 1 - 1)
    denom = 4.0 * (jnp.sum(d2, axis=1, keepdims=True) * inv_n + 1e-4)          # (TB, 1, E)
    y = d2 * pl.reciprocal(denom, approx=True) + 0.5                           # EUP recip
    gated = emb3 * jax.nn.sigmoid(y)

    # EMA_module: the ema buffer is None on the first forward -> identity.
    # TODO(synk): subsequent forwards update/use the stateful EMA buffer; not modeled here.

    # in_linear: bf16 MXU inputs, f32 accumulation; weight is pre-transposed to (E, Hpad).
    x = gated.reshape(rows, emb_size).astype(jnp.bfloat16)
    lin = jnp.dot(x, wt_ref[...], preferred_element_type=jnp.float32) + b_ref[...]

    # Lane-dense (Hpad % 128 == 0) stores of the special-mark row and the S linear rows;
    # the sublane-offset store is far cheaper than a separate XLA concat pass over HBM.
    sp_row = jnp.broadcast_to(sp_ref[...].reshape(1, 1, hpad), (tb, 1, hpad))
    out_ref[:, 0:1, :] = sp_row.astype(out_ref.dtype)
    out_ref[:, 1:, :] = lin.reshape(tb, slen, hpad).astype(out_ref.dtype)


def _pick_batch_block(bs, slen, target_rows=512, min_grid=4):
    # ~512 rows / step fills the MXU M dimension and amortizes per-step overhead (the
    # kernel is HBM-bound); >= min_grid steps keeps >= 2 steps per TensorCore under v7x
    # megacore sharding so ids / output DMAs overlap with compute.
    tb = max(1, min(bs, _cdiv(target_rows, slen)))
    if bs >= min_grid:
        tb = min(tb, max(1, bs // min_grid))
    return tb


@functools.lru_cache(maxsize=None)
def _vmem_cap_bytes():
    phys = 64 << 20                    # v7x per-TensorCore VMEM (smallest of the targets)
    try:
        phys = int(getattr(pltpu.get_tpu_info(), "vmem_capacity_bytes", phys))
    except Exception:
        pass
    return max(16 << 20, phys - (phys >> 3))   # ~12.5% headroom for compiler scratch


def _vmem_budget_bytes(tb, slen, n_token, emb_size, hpad):
    f32, bf16, i32 = 4, 2, 4
    rows = tb * slen
    consts = n_token * emb_size * bf16 + emb_size * hpad * bf16 + 2 * hpad * f32
    if not (_SINGLE_BUFFER_CONSTS and _HAS_BUFFERED):
        consts *= 2                                             # default double buffering
    io = 2 * (rows * i32 + tb * (slen + 1) * hpad * bf16)       # double-buffered ids + out
    live = rows * _round_up(n_token, 128) * bf16                # one-hot (lane padded)
    live += 4 * rows * emb_size * f32                           # emb / diff / d2 / y
    live += rows * emb_size * bf16                              # bf16 copy fed to the MXU
    live += rows * hpad * f32                                   # f32 in_linear accumulator
    budget = consts + io + live + (4 << 20)
    return int(min(max(budget, 16 << 20), _vmem_cap_bytes()))


@functools.lru_cache(maxsize=None)
def _build_front_call(nblk, tb, slen, n_token, emb_size, hpad):
    const_kwargs = {}
    if _SINGLE_BUFFER_CONSTS and _HAS_BUFFERED:
        const_kwargs = dict(pipeline_mode=pl.Buffered(1))
    rows = tb * slen
    grid_spec = pltpu.PrefetchScalarGridSpec(
        num_scalar_prefetch=0,
        grid=(nblk,),
        in_specs=[
            pl.BlockSpec((1, rows, 1), lambda b: (b, 0, 0)),                      # token ids
            pl.BlockSpec((n_token, emb_size), lambda b: (0, 0), **const_kwargs),  # LUT (bf16)
            pl.BlockSpec((emb_size, hpad), lambda b: (0, 0), **const_kwargs),     # W^T (bf16)
            pl.BlockSpec((1, hpad), lambda b: (0, 0), **const_kwargs),            # bias
            pl.BlockSpec((1, hpad), lambda b: (0, 0), **const_kwargs),            # special row
        ],
        out_specs=pl.BlockSpec((tb, slen + 1, hpad), lambda b: (b, 0, 0)),
    )
    return pl.pallas_call(
        _midiformer_front_kernel,
        out_shape=jax.ShapeDtypeStruct((nblk * tb, slen + 1, hpad), jnp.bfloat16),
        grid_spec=grid_spec,
        compiler_params=pltpu.CompilerParams(
            dimension_semantics=("parallel",),
            vmem_limit_bytes=_vmem_budget_bytes(tb, slen, n_token, emb_size, hpad),
        ),
    )


def prepare_midiformer_params(lut, w_in, b_in, former_word_emb):
    """One-time (model-init) prep so the per-call path does no padding / transposing."""
    n_token, emb_size = lut.shape
    hidden = w_in.shape[0]
    hpad = _round_up(hidden, 128)
    lut_scaled = (lut.astype(jnp.float32) * jnp.float32(math.sqrt(emb_size))
                  ).astype(jnp.bfloat16)
    wt = jnp.zeros((emb_size, hpad), jnp.bfloat16).at[:, :hidden].set(
        w_in.T.astype(jnp.bfloat16))
    b_pad = jnp.zeros((1, hpad), jnp.float32).at[0, :hidden].set(b_in.astype(jnp.float32))
    return {"lut": lut_scaled, "wt": wt, "b": b_pad,
            "sp": former_word_emb.astype(jnp.float32)}


@functools.partial(jax.jit, static_argnames=("mode",))
def midiformer_frontend(params, input_id, attn_mask, mode="mlm"):
    """Returns (emb_linear, extended_attn_mask) that would be fed into self.former(...)."""
    lut, wt, b_pad, sp = params["lut"], params["wt"], params["b"], params["sp"]
    bs, slen = input_id.shape
    n_token, emb_size = lut.shape
    hpad = wt.shape[1]
    hidden = sp.shape[1]

    # Special-mark embedding: all-zero ids for mlm, all-one otherwise -> one shared row.
    special_id = 0 if mode == "mlm" else 1
    sp_row = jnp.zeros((1, hpad), jnp.float32).at[0, :hidden].set(sp[special_id])

    tb = _pick_batch_block(bs, slen)
    bs_pad = _cdiv(bs, tb) * tb
    nblk = bs_pad // tb
    ids = input_id.astype(jnp.int32)
    if bs_pad != bs:
        ids = jnp.pad(ids, ((0, bs_pad - bs), (0, 0)))
    ids_blk = ids.reshape(nblk, tb * slen, 1)

    out_pad = _build_front_call(nblk, tb, slen, n_token, emb_size, hpad)(
        ids_blk, lut, wt, b_pad, sp_row)                       # (bs_pad, S+1, hpad) bf16

    # One lazy slice drops batch + lane padding; a consumer that accepts the padded
    # 128-wide layout (e.g. a Pallas attention kernel) could take out_pad directly.
    emb_linear = out_pad[:bs, :, :hidden]

    ext_attn_mask = jnp.concatenate(
        [jnp.ones((bs, 1), attn_mask.dtype), attn_mask], axis=1)
    return emb_linear, ext_attn_mask


def _reference(input_id, attn_mask, lut, w_in, b_in, former_word_emb, mode="mlm"):
    """Pure-JAX reproduction of the PyTorch forward (up to the self.former call)."""
    bs, slen = input_id.shape
    emb = lut[input_id] * math.sqrt(lut.shape[1])                         # Embeddings
    mu = emb.mean(axis=1, keepdims=True)                                  # SimAM over seq
    d2 = (emb - mu) ** 2
    n = slen * 1 - 1
    y = d2 / (4.0 * (d2.sum(axis=1, keepdims=True) / n + 1e-4)) + 0.5
    emb = emb * jax.nn.sigmoid(y)
    lin = emb @ w_in.T + b_in                                             # EMA 1st call = id
    sp = jnp.broadcast_to(
        former_word_emb[0 if mode == "mlm" else 1][None, None, :], (bs, 1, w_in.shape[0]))
    out = jnp.concatenate([sp, lin], axis=1)
    mask = jnp.concatenate([jnp.ones((bs, 1), attn_mask.dtype), attn_mask], axis=1)
    return out, mask


if __name__ == "__main__":
    # Small shapes consistent with the module (emb_size=256 is hardcoded in __init__).
    bs, slen = 4, 8
    n_token = 16          # len(e2w)
    emb_size = 256        # self.emb_size
    hidden = 64           # formerConfig.hidden_size
    former_vocab = 4      # former word-embedding vocab (only ids 0/1 used as special marks)

    key = jax.random.PRNGKey(0)
    k1, k2, k3, k4, k5, k6 = jax.random.split(key, 6)
    lut = jax.random.normal(k1, (n_token, emb_size), jnp.float32) * 0.02
    former_word_emb = jax.random.normal(k2, (former_vocab, hidden), jnp.float32) * 0.02
    w_in = jax.random.normal(k3, (hidden, emb_size), jnp.float32) * 0.02
    b_in = jax.random.normal(k4, (hidden,), jnp.float32) * 0.02
    input_id = jax.random.randint(k5, (bs, slen), 0, n_token, jnp.int32)
    attn_mask = (jax.random.uniform(k6, (bs, slen)) > 0.1).astype(jnp.float32)

    params = prepare_midiformer_params(lut, w_in, b_in, former_word_emb)
    emb_linear, ext_mask = midiformer_frontend(params, input_id, attn_mask, mode="mlm")
    jax.block_until_ready(emb_linear)
    jax.block_until_ready(ext_mask)

    ref_emb, ref_mask = _reference(
        input_id, attn_mask, lut, w_in, b_in, former_word_emb, mode="mlm")
    assert emb_linear.shape == (bs, slen + 1, hidden)
    assert ext_mask.shape == (bs, slen + 1)
    # bf16 LUT, bf16 MXU inputs (f32 accumulation) and bf16 output -> bf16-level tolerance.
    assert jnp.allclose(emb_linear.astype(jnp.float32), ref_emb, rtol=4e-3, atol=4e-3)
    assert jnp.allclose(ext_mask, ref_mask)

    print("KERNEL_OK")
</pallas_src>

<mosaic_0001>
module attributes {stable_mosaic.version = 11 : i64} {
  func.func @_midiformer_front_kernel(%arg0: i32, %arg1: memref<1x8x1xi32, #tpu.memory_space<vmem>>, %arg2: memref<16x256xbf16, #tpu.memory_space<vmem>>, %arg3: memref<256x128xbf16, #tpu.memory_space<vmem>>, %arg4: memref<1x128xf32, #tpu.memory_space<vmem>>, %arg5: memref<1x128xf32, #tpu.memory_space<vmem>>, %arg6: memref<1x9x128xbf16, #tpu.memory_space<vmem>>) attributes {dimension_semantics = [#tpu.dimension_semantics<parallel>], iteration_bounds = array<i64: 4>, scalar_prefetch = 0 : i64, scratch_operands = 0 : i64, tpu.core_type = #tpu.core_type<tc>, window_params = [{transform_indices = @transform_0, window_bounds = array<i64: 1, 8, 1>}, {pipeline_mode = #tpu.pipeline_mode<synchronous>, transform_indices = @transform_1, window_bounds = array<i64: 16, 256>}, {pipeline_mode = #tpu.pipeline_mode<synchronous>, transform_indices = @transform_2, window_bounds = array<i64: 256, 128>}, {pipeline_mode = #tpu.pipeline_mode<synchronous>, transform_indices = @transform_3, window_bounds = array<i64: 1, 128>}, {pipeline_mode = #tpu.pipeline_mode<synchronous>, transform_indices = @transform_4, window_bounds = array<i64: 1, 128>}, {transform_indices = @transform_5, window_bounds = array<i64: 1, 9, 128>}]} {
    %c0 = arith.constant 0 : index
    %c0_0 = arith.constant 0 : index
    %c0_1 = arith.constant 0 : index
    %0 = vector.load %arg1[%c0, %c0_0, %c0_1] : memref<1x8x1xi32, #tpu.memory_space<vmem>>, vector<1x8x1xi32>
    %1 = vector.shape_cast %0 : vector<1x8x1xi32> to vector<8x1xi32>
    %2 = tpu.iota {dimensions = array<i32: 1>} : vector<8x16xi32>
    %3 = vector.broadcast %1 : vector<8x1xi32> to vector<8x16xi32>
    %4 = arith.cmpi eq, %3, %2 : vector<8x16xi32>
    %5 = arith.extui %4 : vector<8x16xi1> to vector<8x16xi32>
    %6 = arith.sitofp %5 : vector<8x16xi32> to vector<8x16xf32>
    %7 = arith.truncf %6 : vector<8x16xf32> to vector<8x16xbf16>
    %c0_2 = arith.constant 0 : index
    %c0_3 = arith.constant 0 : index
    %8 = vector.load %arg2[%c0_2, %c0_3] : memref<16x256xbf16, #tpu.memory_space<vmem>>, vector<16x256xbf16>
    %cst = arith.constant dense<0.000000e+00> : vector<8x256xf32>
    %9 = tpu.matmul %7, %8, %cst {dimension_numbers = #tpu.dot_dimension_numbers<[1], [0], [0], [1], [0, 0, 1, 1], [], []>} : vector<8x16xbf16>, vector<16x256xbf16>, vector<8x256xf32> -> vector<8x256xf32>
    %10 = vector.shape_cast %9 : vector<8x256xf32> to vector<1x8x256xf32>
    %cst_4 = arith.constant dense<0.000000e+00> : vector<1x256xf32>
    %11 = vector.multi_reduction <add>, %10, %cst_4 [1] : vector<1x8x256xf32> to vector<1x256xf32>
    %12 = vector.shape_cast %11 : vector<1x256xf32> to vector<1x1x256xf32>
    %cst_5 = arith.constant 8.000000e+00 : f32
    %13 = vector.broadcast %cst_5 : f32 to vector<1x1x256xf32>
    %14 = arith.divf %12, %13 : vector<1x1x256xf32>
    %15 = vector.broadcast %14 : vector<1x1x256xf32> to vector<1x8x256xf32>
    %16 = arith.subf %10, %15 : vector<1x8x256xf32>
    %17 = arith.mulf %16, %16 : vector<1x8x256xf32>
    %cst_6 = arith.constant dense<0.000000e+00> : vector<1x256xf32>
    %18 = vector.multi_reduction <add>, %17, %cst_6 [1] : vector<1x8x256xf32> to vector<1x256xf32>
    %19 = vector.shape_cast %18 : vector<1x256xf32> to vector<1x1x256xf32>
    %cst_7 = arith.constant 0.142857149 : f32
    %20 = vector.broadcast %cst_7 : f32 to vector<1x1x256xf32>
    %21 = arith.mulf %19, %20 : vector<1x1x256xf32>
    %cst_8 = arith.constant 9.99999974E-5 : f32
    %22 = vector.broadcast %cst_8 : f32 to vector<1x1x256xf32>
    %23 = arith.addf %21, %22 : vector<1x1x256xf32>
    %cst_9 = arith.constant 4.000000e+00 : f32
    %24 = vector.broadcast %cst_9 : f32 to vector<1x1x256xf32>
    %25 = arith.mulf %24, %23 : vector<1x1x256xf32>
    %26 = tpu.reciprocal %25 {approx = true} : vector<1x1x256xf32> -> vector<1x1x256xf32>
    %27 = vector.broadcast %26 : vector<1x1x256xf32> to vector<1x8x256xf32>
    %28 = arith.mulf %17, %27 : vector<1x8x256xf32>
    %cst_10 = arith.constant 5.000000e-01 : f32
    %29 = vector.broadcast %cst_10 : f32 to vector<1x8x256xf32>
    %30 = arith.addf %28, %29 : vector<1x8x256xf32>
    %31 = arith.negf %30 : vector<1x8x256xf32>
    %32 = math.exp %31 : vector<1x8x256xf32>
    %cst_11 = arith.constant 1.000000e+00 : f32
    %33 = vector.broadcast %cst_11 : f32 to vector<1x8x256xf32>
    %34 = arith.addf %33, %32 : vector<1x8x256xf32>
    %35 = arith.divf %33, %34 : vector<1x8x256xf32>
    %36 = arith.mulf %10, %35 : vector<1x8x256xf32>
    %37 = vector.shape_cast %36 : vector<1x8x256xf32> to vector<8x256xf32>
    %38 = arith.truncf %37 : vector<8x256xf32> to vector<8x256xbf16>
    %c0_12 = arith.constant 0 : index
    %c0_13 = arith.constant 0 : index
    %39 = vector.load %arg3[%c0_12, %c0_13] : memref<256x128xbf16, #tpu.memory_space<vmem>>, vector<256x128xbf16>
    %cst_14 = arith.constant dense<0.000000e+00> : vector<8x128xf32>
    %40 = tpu.matmul %38, %39, %cst_14 {dimension_numbers = #tpu.dot_dimension_numbers<[1], [0], [0], [1], [0, 0, 1, 1], [], []>} : vector<8x256xbf16>, vector<256x128xbf16>, vector<8x128xf32> -> vector<8x128xf32>
    %c0_15 = arith.constant 0 : index
    %c0_16 = arith.constant 0 : index
    %41 = vector.load %arg4[%c0_15, %c0_16] : memref<1x128xf32, #tpu.memory_space<vmem>>, vector<1x128xf32>
    %42 = vector.broadcast %41 : vector<1x128xf32> to vector<8x128xf32>
    %43 = arith.addf %40, %42 : vector<8x128xf32>
    %c0_17 = arith.constant 0 : index
    %c0_18 = arith.constant 0 : index
    %44 = vector.load %arg5[%c0_17, %c0_18] : memref<1x128xf32, #tpu.memory_space<vmem>>, vector<1x128xf32>
    %45 = vector.shape_cast %44 : vector<1x128xf32> to vector<1x1x128xf32>
    %46 = arith.truncf %45 : vector<1x1x128xf32> to vector<1x1x128xbf16>
    %c0_19 = arith.constant 0 : index
    %c0_20 = arith.constant 0 : index
    %c0_21 = arith.constant 0 : index
    %47 = vector.load %arg6[%c0_19, %c0_20, %c0_21] : memref<1x9x128xbf16, #tpu.memory_space<vmem>>, vector<1x1x128xbf16>
    tpu.vector_store %arg6[%c0_19, %c0_20, %c0_21], %46 {strides = array<i32>} : memref<1x9x128xbf16, #tpu.memory_space<vmem>>, vector<1x1x128xbf16>,
    %48 = vector.shape_cast %43 : vector<8x128xf32> to vector<1x8x128xf32>
    %49 = arith.truncf %48 : vector<1x8x128xf32> to vector<1x8x128xbf16>
    %c0_22 = arith.constant 0 : index
    %c1 = arith.constant 1 : index
    %c0_23 = arith.constant 0 : index
    %50 = vector.load %arg6[%c0_22, %c1, %c0_23] : memref<1x9x128xbf16, #tpu.memory_space<vmem>>, vector<1x8x128xbf16>
    tpu.vector_store %arg6[%c0_22, %c1, %c0_23], %49 {strides = array<i32>} : memref<1x9x128xbf16, #tpu.memory_space<vmem>>, vector<1x8x128xbf16>,
    return
  }
  func.func @transform_0(%arg0: i32) -> (i32, i32, i32) {
    %c0_i32 = arith.constant 0 : i32
    %c0_i32_0 = arith.constant 0 : i32
    %c0_i32_1 = arith.constant 0 : i32
    return %arg0, %c0_i32, %c0_i32_0 : i32, i32, i32
  }
  func.func @transform_1(%arg0: i32) -> (i32, i32) {
    %c0_i32 = arith.constant 0 : i32
    %c0_i32_0 = arith.constant 0 : i32
    %c0_i32_1 = arith.constant 0 : i32
    return %c0_i32, %c0_i32_0 : i32, i32
  }
  func.func @transform_2(%arg0: i32) -> (i32, i32) {
    %c0_i32 = arith.constant 0 : i32
    %c0_i32_0 = arith.constant 0 : i32
    %c0_i32_1 = arith.constant 0 : i32
    return %c0_i32, %c0_i32_0 : i32, i32
  }
  func.func @transform_3(%arg0: i32) -> (i32, i32) {
    %c0_i32 = arith.constant 0 : i32
    %c0_i32_0 = arith.constant 0 : i32
    %c0_i32_1 = arith.constant 0 : i32
    return %c0_i32, %c0_i32_0 : i32, i32
  }
  func.func @transform_4(%arg0: i32) -> (i32, i32) {
    %c0_i32 = arith.constant 0 : i32
    %c0_i32_0 = arith.constant 0 : i32
    %c0_i32_1 = arith.constant 0 : i32
    return %c0_i32, %c0_i32_0 : i32, i32
  }
  func.func @transform_5(%arg0: i32) -> (i32, i32, i32) {
    %c0_i32 = arith.constant 0 : i32
    %c0_i32_0 = arith.constant 0 : i32
    %c0_i32_1 = arith.constant 0 : i32
    return %arg0, %c0_i32, %c0_i32_0 : i32, i32, i32
  }
}

</mosaic_0001>

<bundles_post_ra>
// kernel: midiformer_frontend.1
= control target key start
LH: loop header
LB: loop body
LE: loop exit
PB: predicated region body
PF: predicated region fallthrough
CT: control target
= control target key end

     0   :  { %10 = vsyncpa [#allocation3], 0  ;;  %s825_s18 = smov 0   ;;  %s892_s0 = inlined_call_operand.vmem [shape: s32[4,8,1], index: 0, kind: input, shape index: {}]   ;;  %s893_s1 = inlined_call_operand.vmem [shape: bf16[16,256], index: 1, kind: input, shape index: {}]   ;;  %s894_s2 = inlined_call_operand.hbm [shape: bf16[256,128], index: 2, kind: input, shape index: {}]   ;;  %s895_s3 = inlined_call_operand.vmem [shape: f32[1,128], index: 3, kind: input, shape index: {}]   ;;  %s896_s4 = inlined_call_operand.vmem [shape: f32[1,128], index: 4, kind: input, shape index: {}]   ;;  %s897_s5 = inlined_call_operand.vmem [shape: bf16[4,9,128], index: 5, kind: output, shape index: {}]  }
   0x1 LB: > { %s831_s19 = sadd.s32 4294967295, %s788_s18   ;;  %p639_p0 = scmp.ge.s32.totalorder %s788_s18, 1  ;;  %s788_s18 = sphi %s825_s18, %s16_s18  }
   0x2   : > { %p157_p1 = scmp.lt.s32.totalorder %s788_s18, 5  ;;  %s790_s20 = smov [#allocation2]  }
   0x3   : > { %s172_s21 = sshll.u32 %s790_s20, 4  ;;  %p705_p3 = scmp.eq.s32.totalorder %s831_s19, 0  ;;  %s173_s21 = int_to_ptr.vmem [resolvable:$true] %s172_s21 }
   0x4   : > { %p835_p2 = pnand %p639_p0, %p157_p1  ;;  %s763_s23 = scalar_lea.vmem %s173_s21, 2048 }
   0x5   : > { %p764_p7 = scmp.ne.s32.totalorder %s173_s21, %s763_s23  ;;  %p771_p10 = scmp.lt.s32.totalorder %s173_s21, %s173_s21 }
   0x6   : > { %p701_p4 = pneg %p835_p2  ;;  %p772_p11 = scmp.lt.s32.totalorder %s763_s23, %s763_s23 }
   0x8   : > { %p702_p5 = pnand %p705_p3, %p701_p4  ;;  %p773_p12 = por %p772_p11, %p771_p10 }
   0xa   : > { %p754_p6 = pneg %p702_p5 }
   0xc   : > { %p766_p8 = pnand %p764_p7, %p754_p6 }
   0xe   : > { %p767_p9 = pneg %p766_p8 }
  0x10   : > { %p774_p13 = pnand %p773_p12, %p767_p9 }
  0x12   : > { %777 = shalt.err (!%p774_p13)
}
  0x13   : > { %s791_s24 = smov 64   ;;  %s792_s25 = smov 4  }
  0x14   : > { %704 = dma.hbm_to_vmem [thread:$0]  (!%p702_p5), %s894_s2, 2048, %s173_s21, [#allocation3], %s791_s24, %s791_s24, %s792_s25  }
  0x15   : > { %201 = sbr.rel (%p835_p2) target bundleno = 656 (0x290), region = 40 }
  0x1a   : > { %783 = dma.done.wait (%p705_p3), [#allocation3], 2048  }
  0x1b   : > { %785 = vsyncadd (%p705_p3), [#allocation3], 4294965248  ;;  %p228_p0 = scmp.lt.s32.totalorder %s831_s19, 3  ;;  %v793_v0 = vmov 0   ;;  %vm541_vm0 = vcmask 1040384   ;;  %v239_v9 = vlaneseq  ;;  %v794_v12 = vmov 0.0  }
  0x1c   : > { %720 = vset.pattern.permute.xlu0 %v793_v0  ;;  %296 = vmatprep.mubr.bf16.mxu0 %v793_v0  ;;  %vm542_vm1 = vsmask.f32 256  ;;  %v539_v3 = vld [vmem:[%s896_s4] sm:$0x1]  ;;  %v721_v6 = vld [vmem:[%s893_s1 + $0x4] ss:$8 sps:$4 sm:$0xff]  }
  0x1d   : > { %s902_s19 = smov (!%p228_p0, %s831_s19), 3  ;;  %vm863_vm2 = vmand %vm541_vm0, %vm542_vm1  ;;  %v540_v5 = vpack.c.bf16 %v539_v3, %v539_v3  ;;  %v723_v7 = vld [vmem:[%s893_s1] ss:$8 sps:$4 sm:$0xff]   ;;  %278 = vmatprep.subr.bf16.mxu0 %v721_v6  ;;  %v240_v10 = vand.u32 127, %v239_v9  ;;  %vm260_vm4 = vcmask 130048   ;;  %v724_v15 = vld [vmem:[#allocation2 + $0x78] sm:$0xff]  }
  0x1e   : > { %s644_s28 = sshll.u32 %s902_s19, 3  ;;  %279 = vmatpush1.bf16.msra.mxu0 %v723_v7  ;;  %v725_v16 = vld [vmem:[#allocation2 + $0x38] sm:$0xff]   ;;  %675 = vmatprep.subr.bf16.mxu1 %v724_v15  ;;  %v726_v17 = vld [vmem:[#allocation2 + $0x70] sm:$0xff]   ;;  %v728_v19 = vld [vmem:[#allocation2 + $0x68] sm:$0xff]   ;;  %vm561_vm5 = vcmask 1043456  }
  0x1f   : > { %s231_s6 = scalar_lea.vmem %s892_s0, %s644_s28  ;;  %s861_s9 = scalar_lea.vmem %s897_s5, %s644_s28  ;;  %676 = vmatpush3.bf16.msra.mxu1 %v725_v16  ;;  %v727_v18 = vld [vmem:[#allocation2 + $0x30] sm:$0xff]   ;;  %v729_v20 = vld [vmem:[#allocation2 + $0x28] sm:$0xff]   ;;  %v730_v21 = vld [vmem:[#allocation2 + $0x60] sm:$0xff]   ;;  %vm562_vm6 = vsmask.f32 7938 }
  0x20   : > { %v238_v2 = vld [vmem:[%s231_s6] sm:$0xff]  ;;  %677 = vmatprep.subr.bf16.mxu1 %v726_v17  ;;  %v732_v23 = vld [vmem:[#allocation2 + $0x58] sm:$0xff]   ;;  %v734_v25 = vld [vmem:[#allocation2 + $0x50] sm:$0xff]  }
  0x21   : > { %v544_v4 = vld [vmem:[%s861_s9] sm:$0x1]  ;;  %242 = vperm.xlu0 %720, %v238_v2   ;;  %v733_v24 = vld [vmem:[#allocation2 + $0x18] sm:$0xff]   ;;  %v735_v26 = vld [vmem:[#allocation2 + $0x10] sm:$0xff]  }
  0x22   : > { %v545_v8 = vsel %vm863_vm2, %v540_v5, %v544_v4  ;;  %v731_v22 = vld [vmem:[#allocation2 + $0x20] sm:$0xff]   ;;  %v736_v27 = vld [vmem:[#allocation2 + $0x48] sm:$0xff]   ;;  %vm563_vm7 = vmand %vm561_vm5, %vm562_vm6 }
  0x23   : > { %546 = vst [vmem:[%s861_s9] sm:$0x1] %v545_v8  ;;  %678 = vmatpush3.bf16.msra.mxu1 %v727_v18  ;;  %v737_v28 = vld [vmem:[#allocation2 + $0x8] sm:$0xff]   ;;  %v738_v29 = vld [vmem:[#allocation2 + $0x40] sm:$0xff]  }
  0x24   : > { %679 = vmatprep.subr.bf16.mxu1 %v728_v19  ;;  %v739_v30 = vld [vmem:[#allocation2] sm:$0xff]  }
  0x27   : > { %680 = vmatpush3.bf16.msra.mxu1 %v729_v20 }
  0x28   : > { %681 = vmatprep.subr.bf16.mxu1 %v730_v21 }
  0x2b   : > { %682 = vmatpush3.bf16.msra.mxu1 %v731_v22 }
  0x2c   : > { %683 = vmatprep.subr.bf16.mxu1 %v732_v23 }
  0x2f   : > { %684 = vmatpush3.bf16.msra.mxu1 %v733_v24 }
  0x30   : > { %685 = vmatprep.subr.bf16.mxu1 %v734_v25 }
  0x33   : > { %686 = vmatpush3.bf16.msra.mxu1 %v735_v26 }
  0x34   : > { %687 = vmatprep.subr.bf16.mxu1 %v736_v27  ;;  %v653_v27 = vld [vmem:[%s895_s3] ss:$0 sm:$0xff] }
  0x37   : > { %688 = vmatpush3.bf16.msra.mxu1 %v737_v28 }
  0x38   : > { %689 = vmatprep.subr.bf16.mxu1 %v738_v29 }
  0x3b   : > { %690 = vmatpush3.bf16.msra.mxu1 %v739_v30 }
  0x9c   : > { %v243_v11 = vpop.permute.xlu0 %242 }
  0x9d   : > { %vm244_vm3 = vcmp.eq.s32.totalorder %v243_v11, %v240_v10 }
  0x9e   : > { %v647_v13 = vsel %vm244_vm3, 1.0, %v794_v12 }
  0x9f   : > { %v247_v14 = vpack.c.bf16 %v647_v13, %v647_v13 }
  0xa1   : > { %650 = vmatmul.mubr.msk.bf16.vlgmr.msra.gmra.mxu0 %vm260_vm4, %v247_v14 }
 0x161   : > { %v298_v31 = vpop.f32.mrf.mxu0 }
 0x162   : > { %v305_v32 = vrot.slane %v298_v31, 4 }
 0x163   : > { %v300_v33 = vpop.f32.mrf.mxu0 }
 0x164   : > { %v306_v34 = vadd.f32 %v305_v32, %v298_v31  ;;  %v311_v35 = vrot.slane %v300_v33, 4 }
 0x165   : > { %v302_v36 = vpop.f32.mrf.mxu0 }
 0x166   : > { %v307_v37 = vrot.slane %v306_v34, 2  ;;  %v312_v38 = vadd.f32 %v311_v35, %v300_v33 }
 0x167   : > { %v303_v39 = vpop.f32.mrf.mxu0 }
 0x168   : > { %v308_v40 = vadd.f32 %v307_v37, %v306_v34  ;;  %v313_v41 = vrot.slane %v312_v38, 2  ;;  %v564_v37 = vld [vmem:[%s861_s9] sm:$0xf] }
 0x16a   : > { %v309_v42 = vrot.slane %v308_v40, 1  ;;  %v314_v43 = vadd.f32 %v313_v41, %v312_v38  ;;  %v567_v38 = vld [vmem:[%s861_s9 + $0x4] sm:$0x1] }
 0x16c   : > { %v310_v44 = vadd.f32 %v309_v42, %v308_v40  ;;  %v315_v45 = vrot.slane %v314_v43, 1 }
 0x16e   : > { %v318_v46 = vmul.f32 0.125, %v310_v44  ;;  %v316_v47 = vadd.f32 %v315_v45, %v314_v43 }
 0x170   : > { %v320_v48 = vsub.f32 %v298_v31, %v318_v46  ;;  %v319_v49 = vmul.f32 0.125, %v316_v47 }
 0x172   : > { %v322_v50 = vmul.f32 %v320_v48, %v320_v48  ;;  %v321_v51 = vsub.f32 %v300_v33, %v319_v49 }
 0x174   : > { %v324_v52 = vrot.slane %v322_v50, 4  ;;  %v323_v53 = vmul.f32 %v321_v51, %v321_v51 }
 0x176   : > { %v325_v54 = vadd.f32 %v324_v52, %v322_v50  ;;  %v330_v55 = vrot.slane %v323_v53, 4 }
 0x178   : > { %v326_v56 = vrot.slane %v325_v54, 2  ;;  %v331_v57 = vadd.f32 %v330_v55, %v323_v53 }
 0x17a   : > { %v327_v58 = vadd.f32 %v326_v56, %v325_v54  ;;  %v332_v59 = vrot.slane %v331_v57, 2 }
 0x17c   : > { %v328_v60 = vrot.slane %v327_v58, 1  ;;  %v333_v61 = vadd.f32 %v332_v59, %v331_v57 }
 0x17e   : > { %v329_v62 = vadd.f32 %v328_v60, %v327_v58  ;;  %v334_v63 = vrot.slane %v333_v61, 1 }
 0x180   : > { %v336_v0 = vmul.f32 0.14285715, %v329_v62  ;;  %v335_v2 = vadd.f32 %v334_v63, %v333_v61 }
 0x182   : > { %v338_v3 = vadd.f32 0.0001, %v336_v0  ;;  %v337_v4 = vmul.f32 0.14285715, %v335_v2 }
 0x184   : > { %v340_v5 = vmul.f32 4.0, %v338_v3  ;;  %v339_v6 = vadd.f32 0.0001, %v337_v4 }
 0x186   : > { %740 = vrcp.f32 %v340_v5  ;;  %v341_v7 = vmul.f32 4.0, %v339_v6 }
 0x188   : > { %742 = vrcp.f32 %v341_v7 }
 0x193   : > { %v741_v8 = vpop.eup %740 }
 0x194   : > { %v344_v9 = vmul.f32 %v741_v8, %v322_v50 }
 0x195   : > { %v743_v10 = vpop.eup %742 }
 0x196   : > { %v346_v11 = vadd.f32 0.5, %v344_v9  ;;  %v345_v12 = vmul.f32 %v743_v10, %v323_v53 }
 0x198   : > { %v651_v13 = vmul.f32 -1.442695, %v346_v11  ;;  %v347_v14 = vadd.f32 0.5, %v345_v12 }
 0x19a   : > { %744 = vpow2.f32 %v651_v13  ;;  %v652_v15 = vmul.f32 -1.442695, %v347_v14 }
 0x19c   : > { %746 = vpow2.f32 %v652_v15 }
 0x1a7   : > { %v745_v16 = vpop.eup %744 }
 0x1a8   : > { %v354_v17 = vadd.f32 1.0, %v745_v16 }
 0x1a9   : > { %v747_v18 = vpop.eup %746 }
 0x1aa   : > { %748 = vrcp.f32 %v354_v17  ;;  %v355_v19 = vadd.f32 1.0, %v747_v18 }
 0x1ac   : > { %750 = vrcp.f32 %v355_v19 }
 0x1b7   : > { %v749_v20 = vpop.eup %748 }
 0x1b8   : > { %v360_v22 = vmul.f32 %v749_v20, %v298_v31 }
 0x1b9   : > { %v751_v21 = vpop.eup %750 }
 0x1ba   : > { %v361_v23 = vmul.f32 %v751_v21, %v300_v33  ;;  %v362_v25 = vpack.c.bf16 %v360_v22, %v360_v22 }
 0x1bc   : > { %v363_v24 = vpack.c.bf16 %v361_v23, %v361_v23 }
 0x1be   : > { %531 = vmatprep.mubr.bf16.mxu1 %v363_v24 }
 0x1bf   : > { %532 = vmatmul.mubr.bf16.vlgmr.msra.gmra.mxu1 %v362_v25 }
 0x27f   : > { %v691_v26 = vpop.f32.mrf.mxu1 }
 0x281   : > { %v692_v28 = vpop.f32.mrf.mxu1 }
 0x282   : > { %v693_v29 = vadd.f32 %v692_v28, %v691_v26 }
 0x283   : > { %v694_v30 = vpop.f32.mrf.mxu1 }
 0x284   : > { %v534_v32 = vadd.f32 %v693_v29, %v653_v27 }
 0x285   : > { %v695_v34 = vpop.f32.mrf.mxu1 }
 0x286   : > { %v674_v31 = vpack.c.bf16 %v534_v32, %v534_v32 }
 0x288   : > { %v552_v33 = vshrl.u32 %v674_v31, 16  ;;  %v555_v36 = vshll.u32 %v674_v31, 16 }
 0x28a   : > { %v554_v35 = vrot.slane %v552_v33, 7 }
 0x28c   : > { %v557_v39 = vor.u32 %v555_v36, %v554_v35  ;;  %v558_v40 = vrot.slane %v554_v35, 4 }
 0x28e   : > { %v565_v41 = vsel %vm563_vm7, %v557_v39, %v564_v37  ;;  %v568_v42 = vsel %vm863_vm2, %v558_v40, %v567_v38 }
 0x28f   : > { %566 = vst [vmem:[%s861_s9] sm:$0xf] %v565_v41  ;;  %569 = vst [vmem:[%s861_s9 + $0x4] sm:$0x1] %v568_v42 }
 0x290 PF: > { %s16_s18 = sadd.s32 1, %s788_s18  }
 0x291   : > { %p13_p1 = scmp.ge.s32.totalorder %s16_s18, 6  }
 0x293   :  { %15 = sbr.rel (!%p13_p1) target bundleno = 1 (0x1), region = 75 }
 0x298   :  { %591 = vsyncpa [#allocation3], 1 }
 0x299   :  { %593 = vsyncpa [#allocation3 + $0x1], 1 }

</bundles_post_ra>
